<compile_context>
chip_gen: v6e
topology: v6e:2x2x1
jax: 0.10.0
libtpu: 0.0.40
codegen_flags: <defaults>
</compile_context>

<pallas_src>
import functools
import math

import numpy as np
import jax
import jax.numpy as jnp
from jax.experimental import pallas as pl
from jax.experimental.pallas import tpu as pltpu


def _round_up(x, m):
    return ((x + m - 1) // m) * m


def _self_output_kernel(x_ref, res_ref, wt_ref, b_ref, gate_ref, mscaled_ref,
                        gamma2_ref, beta2_ref, out_ref, *, eps):
    # Dense projection on the MXU: bf16 operands, f32 accumulation.
    x = x_ref[...].astype(jnp.bfloat16)
    h = jnp.dot(x, wt_ref[...], preferred_element_type=jnp.float32)
    # bias + folded (head_layer_z * hidden_z) gate, residual add in f32.
    h = (h + b_ref[...]) * gate_ref[...]
    y = h + res_ref[...].astype(jnp.float32)

    # CoFi masked LayerNorm, one-pass statistics.
    # mscaled = (hidden_z != 0) / max(#active, 1)  ->  the sums below are already means
    # over the active (un-pruned) features only.
    ms = mscaled_ref[...]
    mu = jnp.sum(y * ms, axis=-1, keepdims=True)
    s2 = jnp.sum((y * y) * ms, axis=-1, keepdims=True)
    var = jnp.maximum(s2 - mu * mu, 0.0)
    inv_std = jax.lax.rsqrt(var + eps)                      # EUP slot
    # gamma2 = gamma*hidden_z, beta2 = beta*hidden_z: pruned features come out exactly 0,
    # matching (skip-LayerNorm value) * hidden_z == 0 of the PyTorch module.
    out = (y - mu) * inv_std * gamma2_ref[...] + beta2_ref[...]
    out_ref[...] = out.astype(out_ref.dtype)                # single lane-dense store


def prepare_cofi_self_output_params(dense_w, dense_b, ln_weight, ln_bias, *,
                                    eps=1e-12, head_layer_z=None, hidden_z=None):
    """One-time (per layer) parameter preparation, hoisted out of the hot path.

    dense_w follows nn.Linear convention [out_features, in_features].
    """
    H = dense_w.shape[0]
    wt = jnp.asarray(dense_w).T.astype(jnp.bfloat16)        # [in, out], bf16 for MXU
    b = jnp.asarray(dense_b, jnp.float32).reshape(1, H)
    gamma = jnp.asarray(ln_weight, jnp.float32).reshape(1, H)
    beta = jnp.asarray(ln_bias, jnp.float32).reshape(1, H)
    if hidden_z is None:
        hz = jnp.ones((1, H), jnp.float32)
    else:
        hz = jnp.asarray(hidden_z, jnp.float32).reshape(1, H)
    hlz = (jnp.float32(1.0) if head_layer_z is None
           else jnp.asarray(head_layer_z, jnp.float32))
    gate = hz * hlz                                         # fold head_layer_z scalar
    mask = (hz != 0.0).astype(jnp.float32)
    denom = jnp.maximum(jnp.sum(mask), 1.0)                 # guard all-pruned hidden_z
    mscaled = mask / denom
    return dict(wt=wt, b=b, gate=gate, mscaled=mscaled,
                gamma2=gamma * hz, beta2=beta * hz, eps=float(eps))


def cofi_bert_self_output_prepared(hidden_states, input_tensor, params, *,
                                   row_tile=512):
    """Run the fused CoFiBertSelfOutput forward with pre-prepared parameters."""
    if hidden_states is None:
        return input_tensor

    B, S, H = hidden_states.shape
    R = B * S
    x2 = hidden_states.reshape(R, H)          # caller dtype; kernel casts to bf16
    res2 = input_tensor.reshape(R, H)         # caller dtype; kernel casts to f32
    out_dtype = hidden_states.dtype

    TM = min(row_tile, _round_up(R, 8))
    grid = (pl.cdiv(R, TM),)                  # partial last block: Pallas masks writes

    x_bytes = jnp.dtype(x2.dtype).itemsize
    res_bytes = jnp.dtype(res2.dtype).itemsize
    out_bytes = jnp.dtype(out_dtype).itemsize

    cost = pl.CostEstimate(
        flops=int(2 * R * H * H),
        transcendentals=int(R),
        bytes_accessed=int(R * H * (x_bytes + res_bytes + out_bytes) + H * H * 2),
    )

    # Rough VMEM budget: double-buffered I/O tiles + weight + f32 LN temporaries.
    # Only raise the scoped limit when it actually exceeds conservative defaults.
    vmem_est = (2 * TM * H * (x_bytes + res_bytes + out_bytes)
                + 2 * H * H * 2 + 4 * TM * H * 4)
    vmem_limit = None
    if vmem_est > 12 * 1024 * 1024:
        vmem_limit = min(int(vmem_est * 1.5) + (4 << 20), 96 * 1024 * 1024)

    kernel = functools.partial(_self_output_kernel, eps=params["eps"])

    def build(single_buffer_weight):
        if single_buffer_weight:
            # Constant index_map => never re-DMA'd; request a single VMEM buffer to
            # free headroom (most relevant on v5e's 16 MiB scoped / v7x's 64 MiB VMEM).
            wt_spec = pl.BlockSpec((H, H), lambda i: (0, 0),
                                   pipeline_mode=pl.Buffered(buffer_count=1))
        else:
            wt_spec = pl.BlockSpec((H, H), lambda i: (0, 0))
        grid_spec = pltpu.PrefetchScalarGridSpec(
            num_scalar_prefetch=0,
            grid=grid,
            in_specs=[
                pl.BlockSpec((TM, H), lambda i: (i, 0)),    # x tile
                pl.BlockSpec((TM, H), lambda i: (i, 0)),    # residual tile
                wt_spec,                                    # W^T (bf16), constant block
                pl.BlockSpec((1, H), lambda i: (0, 0)),     # bias
                pl.BlockSpec((1, H), lambda i: (0, 0)),     # gate = hidden_z*head_layer_z
                pl.BlockSpec((1, H), lambda i: (0, 0)),     # mask / active count
                pl.BlockSpec((1, H), lambda i: (0, 0)),     # gamma * hidden_z
                pl.BlockSpec((1, H), lambda i: (0, 0)),     # beta * hidden_z
            ],
            out_specs=pl.BlockSpec((TM, H), lambda i: (i, 0)),
        )
        return pl.pallas_call(
            kernel,
            grid_spec=grid_spec,
            out_shape=jax.ShapeDtypeStruct((R, H), out_dtype),
            compiler_params=pltpu.CompilerParams(
                dimension_semantics=("parallel",),
                vmem_limit_bytes=vmem_limit),
            cost_estimate=cost,
        )

    args = (x2, res2, params["wt"], params["b"], params["gate"],
            params["mscaled"], params["gamma2"], params["beta2"])
    try:
        out = build(True)(*args)
    except Exception:
        # pipeline_mode=Buffered(1) unavailable on this jax/Mosaic version -> default.
        out = build(False)(*args)

    return out.reshape(B, S, H)


def cofi_bert_self_output(hidden_states, input_tensor, dense_w, dense_b,
                          ln_weight, ln_bias, *, eps=1e-12, head_layer_z=None,
                          hidden_z=None, row_tile=512):
    """Convenience wrapper: prepare params (normally hoisted/cached) + run."""
    params = prepare_cofi_self_output_params(
        dense_w, dense_b, ln_weight, ln_bias, eps=eps,
        head_layer_z=head_layer_z, hidden_z=hidden_z)
    return cofi_bert_self_output_prepared(hidden_states, input_tensor, params,
                                          row_tile=row_tile)


def _reference(hidden_states, input_tensor, w, b, gamma, beta, eps,
               head_layer_z, hidden_z):
    """Pure-JAX re-implementation of the PyTorch forward (inference path)."""
    h = hidden_states.astype(jnp.float32) @ w.T + b
    if head_layer_z is not None:
        h = h * head_layer_z
    if hidden_z is not None:
        h = h * hidden_z
    y = h + input_tensor.astype(jnp.float32)
    if hidden_z is not None:
        idx = np.where(np.array(hidden_z) != 0)[0]
        yc = y[..., idx]
        mu = yc.mean(-1, keepdims=True)
        var = ((yc - mu) ** 2).mean(-1, keepdims=True)
        normc = (yc - mu) / jnp.sqrt(var + eps) * gamma[idx] + beta[idx]
        out = y.at[..., idx].set(normc)
        out = out * hidden_z
    else:
        mu = y.mean(-1, keepdims=True)
        var = ((y - mu) ** 2).mean(-1, keepdims=True)
        out = (y - mu) / jnp.sqrt(var + eps) * gamma + beta
    return out


if __name__ == "__main__":
    # Small config consistent with the module: hidden=32, seq=8, batch=2.
    B, S, H = 2, 8, 32
    eps = 1e-12

    key = jax.random.PRNGKey(0)
    ks = jax.random.split(key, 7)
    hidden = jax.random.normal(ks[0], (B, S, H), jnp.float32)
    residual = jax.random.normal(ks[1], (B, S, H), jnp.float32)
    w = jax.random.normal(ks[2], (H, H), jnp.float32) / math.sqrt(H)
    b = jax.random.normal(ks[3], (H,), jnp.float32) * 0.02
    gamma = 1.0 + 0.1 * jax.random.normal(ks[4], (H,), jnp.float32)
    beta = 0.02 * jax.random.normal(ks[5], (H,), jnp.float32)

    head_layer_z = jnp.asarray(0.8, jnp.float32)
    hz_np = np.array(jax.random.uniform(ks[6], (H,), jnp.float32, 0.5, 1.0))
    hz_np[[3, 11, 20, 31]] = 0.0          # prune a few hidden dims
    hidden_z = jnp.asarray(hz_np)

    # CoFi-gated path: head_layer_z + hidden_z (masked LayerNorm).
    out = cofi_bert_self_output(hidden, residual, w, b, gamma, beta, eps=eps,
                                head_layer_z=head_layer_z, hidden_z=hidden_z)
    jax.block_until_ready(out)
    ref = _reference(hidden, residual, w, b, gamma, beta, eps,
                     head_layer_z, hidden_z)
    assert jnp.allclose(out, ref, atol=3e-2, rtol=3e-2), "CoFi-gated path mismatch"

    # Vanilla path: no gates -> plain dense + residual + LayerNorm.
    out2 = cofi_bert_self_output(hidden, residual, w, b, gamma, beta, eps=eps)
    jax.block_until_ready(out2)
    ref2 = _reference(hidden, residual, w, b, gamma, beta, eps, None, None)
    assert jnp.allclose(out2, ref2, atol=3e-2, rtol=3e-2), "vanilla path mismatch"

    # Low-byte path: bf16 activations in -> bf16 out (the 6 B/elem HBM stream).
    out3 = cofi_bert_self_output(hidden.astype(jnp.bfloat16),
                                 residual.astype(jnp.bfloat16),
                                 w, b, gamma, beta, eps=eps,
                                 head_layer_z=head_layer_z, hidden_z=hidden_z)
    jax.block_until_ready(out3)
    assert out3.dtype == jnp.bfloat16
    assert bool(jnp.all(jnp.isfinite(out3.astype(jnp.float32)))), "bf16 path not finite"

    print("KERNEL_OK")
</pallas_src>

<mosaic_0001>
module attributes {stable_mosaic.version = 11 : i64} {
  func.func @_self_output_kernel(%arg0: i32, %arg1: memref<16x32xf32, #tpu.memory_space<vmem>>, %arg2: memref<16x32xf32, #tpu.memory_space<vmem>>, %arg3: memref<32x32xbf16, #tpu.memory_space<vmem>>, %arg4: memref<1x32xf32, #tpu.memory_space<vmem>>, %arg5: memref<1x32xf32, #tpu.memory_space<vmem>>, %arg6: memref<1x32xf32, #tpu.memory_space<vmem>>, %arg7: memref<1x32xf32, #tpu.memory_space<vmem>>, %arg8: memref<1x32xf32, #tpu.memory_space<vmem>>, %arg9: memref<16x32xf32, #tpu.memory_space<vmem>>) attributes {dimension_semantics = [#tpu.dimension_semantics<parallel>], iteration_bounds = array<i64: 1>, scalar_prefetch = 0 : i64, scratch_operands = 0 : i64, tpu.core_type = #tpu.core_type<tc>, window_params = [{transform_indices = @transform_0, window_bounds = array<i64: 16, 32>}, {transform_indices = @transform_1, window_bounds = array<i64: 16, 32>}, {pipeline_mode = #tpu.pipeline_mode<synchronous>, transform_indices = @transform_2, window_bounds = array<i64: 32, 32>}, {pipeline_mode = #tpu.pipeline_mode<synchronous>, transform_indices = @transform_3, window_bounds = array<i64: 1, 32>}, {pipeline_mode = #tpu.pipeline_mode<synchronous>, transform_indices = @transform_4, window_bounds = array<i64: 1, 32>}, {pipeline_mode = #tpu.pipeline_mode<synchronous>, transform_indices = @transform_5, window_bounds = array<i64: 1, 32>}, {pipeline_mode = #tpu.pipeline_mode<synchronous>, transform_indices = @transform_6, window_bounds = array<i64: 1, 32>}, {pipeline_mode = #tpu.pipeline_mode<synchronous>, transform_indices = @transform_7, window_bounds = array<i64: 1, 32>}, {transform_indices = @transform_8, window_bounds = array<i64: 16, 32>}]} {
    %c0 = arith.constant 0 : index
    %c0_0 = arith.constant 0 : index
    %0 = vector.load %arg1[%c0, %c0_0] : memref<16x32xf32, #tpu.memory_space<vmem>>, vector<16x32xf32>
    %1 = arith.truncf %0 : vector<16x32xf32> to vector<16x32xbf16>
    %c0_1 = arith.constant 0 : index
    %c0_2 = arith.constant 0 : index
    %2 = vector.load %arg3[%c0_1, %c0_2] : memref<32x32xbf16, #tpu.memory_space<vmem>>, vector<32x32xbf16>
    %cst = arith.constant dense<0.000000e+00> : vector<16x32xf32>
    %3 = tpu.matmul %1, %2, %cst {dimension_numbers = #tpu.dot_dimension_numbers<[1], [0], [0], [1], [0, 0, 1, 1], [], []>} : vector<16x32xbf16>, vector<32x32xbf16>, vector<16x32xf32> -> vector<16x32xf32>
    %c0_3 = arith.constant 0 : index
    %c0_4 = arith.constant 0 : index
    %4 = vector.load %arg4[%c0_3, %c0_4] : memref<1x32xf32, #tpu.memory_space<vmem>>, vector<1x32xf32>
    %5 = vector.broadcast %4 : vector<1x32xf32> to vector<16x32xf32>
    %6 = arith.addf %3, %5 : vector<16x32xf32>
    %c0_5 = arith.constant 0 : index
    %c0_6 = arith.constant 0 : index
    %7 = vector.load %arg5[%c0_5, %c0_6] : memref<1x32xf32, #tpu.memory_space<vmem>>, vector<1x32xf32>
    %8 = vector.broadcast %7 : vector<1x32xf32> to vector<16x32xf32>
    %9 = arith.mulf %6, %8 : vector<16x32xf32>
    %c0_7 = arith.constant 0 : index
    %c0_8 = arith.constant 0 : index
    %10 = vector.load %arg2[%c0_7, %c0_8] : memref<16x32xf32, #tpu.memory_space<vmem>>, vector<16x32xf32>
    %11 = arith.addf %9, %10 : vector<16x32xf32>
    %c0_9 = arith.constant 0 : index
    %c0_10 = arith.constant 0 : index
    %12 = vector.load %arg6[%c0_9, %c0_10] : memref<1x32xf32, #tpu.memory_space<vmem>>, vector<1x32xf32>
    %13 = vector.broadcast %12 : vector<1x32xf32> to vector<16x32xf32>
    %14 = arith.mulf %11, %13 : vector<16x32xf32>
    %cst_11 = arith.constant dense<0.000000e+00> : vector<16xf32>
    %15 = vector.multi_reduction <add>, %14, %cst_11 [1] : vector<16x32xf32> to vector<16xf32>
    %16 = vector.shape_cast %15 : vector<16xf32> to vector<16x1xf32>
    %17 = arith.mulf %11, %11 : vector<16x32xf32>
    %18 = vector.broadcast %12 : vector<1x32xf32> to vector<16x32xf32>
    %19 = arith.mulf %17, %18 : vector<16x32xf32>
    %cst_12 = arith.constant dense<0.000000e+00> : vector<16xf32>
    %20 = vector.multi_reduction <add>, %19, %cst_12 [1] : vector<16x32xf32> to vector<16xf32>
    %21 = vector.shape_cast %20 : vector<16xf32> to vector<16x1xf32>
    %22 = arith.mulf %16, %16 : vector<16x1xf32>
    %23 = arith.subf %21, %22 : vector<16x1xf32>
    %cst_13 = arith.constant 0.000000e+00 : f32
    %24 = vector.broadcast %cst_13 : f32 to vector<16x1xf32>
    %25 = arith.maximumf %23, %24 : vector<16x1xf32>
    %cst_14 = arith.constant 9.99999996E-13 : f32
    %26 = vector.broadcast %cst_14 : f32 to vector<16x1xf32>
    %27 = arith.addf %25, %26 : vector<16x1xf32>
    %28 = math.rsqrt %27 : vector<16x1xf32>
    %29 = vector.broadcast %16 : vector<16x1xf32> to vector<16x32xf32>
    %30 = arith.subf %11, %29 : vector<16x32xf32>
    %31 = vector.broadcast %28 : vector<16x1xf32> to vector<16x32xf32>
    %32 = arith.mulf %30, %31 : vector<16x32xf32>
    %c0_15 = arith.constant 0 : index
    %c0_16 = arith.constant 0 : index
    %33 = vector.load %arg7[%c0_15, %c0_16] : memref<1x32xf32, #tpu.memory_space<vmem>>, vector<1x32xf32>
    %34 = vector.broadcast %33 : vector<1x32xf32> to vector<16x32xf32>
    %35 = arith.mulf %32, %34 : vector<16x32xf32>
    %c0_17 = arith.constant 0 : index
    %c0_18 = arith.constant 0 : index
    %36 = vector.load %arg8[%c0_17, %c0_18] : memref<1x32xf32, #tpu.memory_space<vmem>>, vector<1x32xf32>
    %37 = vector.broadcast %36 : vector<1x32xf32> to vector<16x32xf32>
    %38 = arith.addf %35, %37 : vector<16x32xf32>
    %c0_19 = arith.constant 0 : index
    %c0_20 = arith.constant 0 : index
    %39 = vector.load %arg9[%c0_19, %c0_20] : memref<16x32xf32, #tpu.memory_space<vmem>>, vector<16x32xf32>
    tpu.vector_store %arg9[%c0_19, %c0_20], %38 {strides = array<i32>} : memref<16x32xf32, #tpu.memory_space<vmem>>, vector<16x32xf32>,
    return
  }
  func.func @transform_0(%arg0: i32) -> (i32, i32) {
    %c0_i32 = arith.constant 0 : i32
    %c0_i32_0 = arith.constant 0 : i32
    return %arg0, %c0_i32 : i32, i32
  }
  func.func @transform_1(%arg0: i32) -> (i32, i32) {
    %c0_i32 = arith.constant 0 : i32
    %c0_i32_0 = arith.constant 0 : i32
    return %arg0, %c0_i32 : i32, i32
  }
  func.func @transform_2(%arg0: i32) -> (i32, i32) {
    %c0_i32 = arith.constant 0 : i32
    %c0_i32_0 = arith.constant 0 : i32
    %c0_i32_1 = arith.constant 0 : i32
    return %c0_i32, %c0_i32_0 : i32, i32
  }
  func.func @transform_3(%arg0: i32) -> (i32, i32) {
    %c0_i32 = arith.constant 0 : i32
    %c0_i32_0 = arith.constant 0 : i32
    %c0_i32_1 = arith.constant 0 : i32
    return %c0_i32, %c0_i32_0 : i32, i32
  }
  func.func @transform_4(%arg0: i32) -> (i32, i32) {
    %c0_i32 = arith.constant 0 : i32
    %c0_i32_0 = arith.constant 0 : i32
    %c0_i32_1 = arith.constant 0 : i32
    return %c0_i32, %c0_i32_0 : i32, i32
  }
  func.func @transform_5(%arg0: i32) -> (i32, i32) {
    %c0_i32 = arith.constant 0 : i32
    %c0_i32_0 = arith.constant 0 : i32
    %c0_i32_1 = arith.constant 0 : i32
    return %c0_i32, %c0_i32_0 : i32, i32
  }
  func.func @transform_6(%arg0: i32) -> (i32, i32) {
    %c0_i32 = arith.constant 0 : i32
    %c0_i32_0 = arith.constant 0 : i32
    %c0_i32_1 = arith.constant 0 : i32
    return %c0_i32, %c0_i32_0 : i32, i32
  }
  func.func @transform_7(%arg0: i32) -> (i32, i32) {
    %c0_i32 = arith.constant 0 : i32
    %c0_i32_0 = arith.constant 0 : i32
    %c0_i32_1 = arith.constant 0 : i32
    return %c0_i32, %c0_i32_0 : i32, i32
  }
  func.func @transform_8(%arg0: i32) -> (i32, i32) {
    %c0_i32 = arith.constant 0 : i32
    %c0_i32_0 = arith.constant 0 : i32
    return %arg0, %c0_i32 : i32, i32
  }
}

module attributes {stable_mosaic.version = 11 : i64} {
  func.func @_self_output_kernel(%arg0: i32, %arg1: memref<16x32xf32, #tpu.memory_space<vmem>>, %arg2: memref<16x32xf32, #tpu.memory_space<vmem>>, %arg3: memref<32x32xbf16, #tpu.memory_space<vmem>>, %arg4: memref<1x32xf32, #tpu.memory_space<vmem>>, %arg5: memref<1x32xf32, #tpu.memory_space<vmem>>, %arg6: memref<1x32xf32, #tpu.memory_space<vmem>>, %arg7: memref<1x32xf32, #tpu.memory_space<vmem>>, %arg8: memref<1x32xf32, #tpu.memory_space<vmem>>, %arg9: memref<16x32xf32, #tpu.memory_space<vmem>>) attributes {dimension_semantics = [#tpu.dimension_semantics<parallel>], iteration_bounds = array<i64: 1>, scalar_prefetch = 0 : i64, scratch_operands = 0 : i64, tpu.core_type = #tpu.core_type<tc>, window_params = [{transform_indices = @transform_0, window_bounds = array<i64: 16, 32>}, {transform_indices = @transform_1, window_bounds = array<i64: 16, 32>}, {pipeline_mode = #tpu.pipeline_mode<synchronous>, transform_indices = @transform_2, window_bounds = array<i64: 32, 32>}, {pipeline_mode = #tpu.pipeline_mode<synchronous>, transform_indices = @transform_3, window_bounds = array<i64: 1, 32>}, {pipeline_mode = #tpu.pipeline_mode<synchronous>, transform_indices = @transform_4, window_bounds = array<i64: 1, 32>}, {pipeline_mode = #tpu.pipeline_mode<synchronous>, transform_indices = @transform_5, window_bounds = array<i64: 1, 32>}, {pipeline_mode = #tpu.pipeline_mode<synchronous>, transform_indices = @transform_6, window_bounds = array<i64: 1, 32>}, {pipeline_mode = #tpu.pipeline_mode<synchronous>, transform_indices = @transform_7, window_bounds = array<i64: 1, 32>}, {transform_indices = @transform_8, window_bounds = array<i64: 16, 32>}]} {
    %c0 = arith.constant 0 : index
    %c0_0 = arith.constant 0 : index
    %0 = vector.load %arg1[%c0, %c0_0] : memref<16x32xf32, #tpu.memory_space<vmem>>, vector<16x32xf32>
    %1 = arith.truncf %0 : vector<16x32xf32> to vector<16x32xbf16>
    %c0_1 = arith.constant 0 : index
    %c0_2 = arith.constant 0 : index
    %2 = vector.load %arg3[%c0_1, %c0_2] : memref<32x32xbf16, #tpu.memory_space<vmem>>, vector<32x32xbf16>
    %cst = arith.constant dense<0.000000e+00> : vector<16x32xf32>
    %3 = tpu.matmul %1, %2, %cst {dimension_numbers = #tpu.dot_dimension_numbers<[1], [0], [0], [1], [0, 0, 1, 1], [], []>} : vector<16x32xbf16>, vector<32x32xbf16>, vector<16x32xf32> -> vector<16x32xf32>
    %c0_3 = arith.constant 0 : index
    %c0_4 = arith.constant 0 : index
    %4 = vector.load %arg4[%c0_3, %c0_4] : memref<1x32xf32, #tpu.memory_space<vmem>>, vector<1x32xf32>
    %5 = vector.broadcast %4 : vector<1x32xf32> to vector<16x32xf32>
    %6 = arith.addf %3, %5 : vector<16x32xf32>
    %c0_5 = arith.constant 0 : index
    %c0_6 = arith.constant 0 : index
    %7 = vector.load %arg5[%c0_5, %c0_6] : memref<1x32xf32, #tpu.memory_space<vmem>>, vector<1x32xf32>
    %8 = vector.broadcast %7 : vector<1x32xf32> to vector<16x32xf32>
    %9 = arith.mulf %6, %8 : vector<16x32xf32>
    %c0_7 = arith.constant 0 : index
    %c0_8 = arith.constant 0 : index
    %10 = vector.load %arg2[%c0_7, %c0_8] : memref<16x32xf32, #tpu.memory_space<vmem>>, vector<16x32xf32>
    %11 = arith.addf %9, %10 : vector<16x32xf32>
    %c0_9 = arith.constant 0 : index
    %c0_10 = arith.constant 0 : index
    %12 = vector.load %arg6[%c0_9, %c0_10] : memref<1x32xf32, #tpu.memory_space<vmem>>, vector<1x32xf32>
    %13 = vector.broadcast %12 : vector<1x32xf32> to vector<16x32xf32>
    %14 = arith.mulf %11, %13 : vector<16x32xf32>
    %cst_11 = arith.constant dense<0.000000e+00> : vector<16xf32>
    %15 = vector.multi_reduction <add>, %14, %cst_11 [1] : vector<16x32xf32> to vector<16xf32>
    %16 = vector.shape_cast %15 : vector<16xf32> to vector<16x1xf32>
    %17 = arith.mulf %11, %11 : vector<16x32xf32>
    %18 = vector.broadcast %12 : vector<1x32xf32> to vector<16x32xf32>
    %19 = arith.mulf %17, %18 : vector<16x32xf32>
    %cst_12 = arith.constant dense<0.000000e+00> : vector<16xf32>
    %20 = vector.multi_reduction <add>, %19, %cst_12 [1] : vector<16x32xf32> to vector<16xf32>
    %21 = vector.shape_cast %20 : vector<16xf32> to vector<16x1xf32>
    %22 = arith.mulf %16, %16 : vector<16x1xf32>
    %23 = arith.subf %21, %22 : vector<16x1xf32>
    %cst_13 = arith.constant 0.000000e+00 : f32
    %24 = vector.broadcast %cst_13 : f32 to vector<16x1xf32>
    %25 = arith.maximumf %23, %24 : vector<16x1xf32>
    %cst_14 = arith.constant 9.99999996E-13 : f32
    %26 = vector.broadcast %cst_14 : f32 to vector<16x1xf32>
    %27 = arith.addf %25, %26 : vector<16x1xf32>
    %28 = math.rsqrt %27 : vector<16x1xf32>
    %29 = vector.broadcast %16 : vector<16x1xf32> to vector<16x32xf32>
    %30 = arith.subf %11, %29 : vector<16x32xf32>
    %31 = vector.broadcast %28 : vector<16x1xf32> to vector<16x32xf32>
    %32 = arith.mulf %30, %31 : vector<16x32xf32>
    %c0_15 = arith.constant 0 : index
    %c0_16 = arith.constant 0 : index
    %33 = vector.load %arg7[%c0_15, %c0_16] : memref<1x32xf32, #tpu.memory_space<vmem>>, vector<1x32xf32>
    %34 = vector.broadcast %33 : vector<1x32xf32> to vector<16x32xf32>
    %35 = arith.mulf %32, %34 : vector<16x32xf32>
    %c0_17 = arith.constant 0 : index
    %c0_18 = arith.constant 0 : index
    %36 = vector.load %arg8[%c0_17, %c0_18] : memref<1x32xf32, #tpu.memory_space<vmem>>, vector<1x32xf32>
    %37 = vector.broadcast %36 : vector<1x32xf32> to vector<16x32xf32>
    %38 = arith.addf %35, %37 : vector<16x32xf32>
    %c0_19 = arith.constant 0 : index
    %c0_20 = arith.constant 0 : index
    %39 = vector.load %arg9[%c0_19, %c0_20] : memref<16x32xf32, #tpu.memory_space<vmem>>, vector<16x32xf32>
    tpu.vector_store %arg9[%c0_19, %c0_20], %38 {strides = array<i32>} : memref<16x32xf32, #tpu.memory_space<vmem>>, vector<16x32xf32>,
    return
  }
  func.func @transform_0(%arg0: i32) -> (i32, i32) {
    %c0_i32 = arith.constant 0 : i32
    %c0_i32_0 = arith.constant 0 : i32
    return %arg0, %c0_i32 : i32, i32
  }
  func.func @transform_1(%arg0: i32) -> (i32, i32) {
    %c0_i32 = arith.constant 0 : i32
    %c0_i32_0 = arith.constant 0 : i32
    return %arg0, %c0_i32 : i32, i32
  }
  func.func @transform_2(%arg0: i32) -> (i32, i32) {
    %c0_i32 = arith.constant 0 : i32
    %c0_i32_0 = arith.constant 0 : i32
    %c0_i32_1 = arith.constant 0 : i32
    return %c0_i32, %c0_i32_0 : i32, i32
  }
  func.func @transform_3(%arg0: i32) -> (i32, i32) {
    %c0_i32 = arith.constant 0 : i32
    %c0_i32_0 = arith.constant 0 : i32
    %c0_i32_1 = arith.constant 0 : i32
    return %c0_i32, %c0_i32_0 : i32, i32
  }
  func.func @transform_4(%arg0: i32) -> (i32, i32) {
    %c0_i32 = arith.constant 0 : i32
    %c0_i32_0 = arith.constant 0 : i32
    %c0_i32_1 = arith.constant 0 : i32
    return %c0_i32, %c0_i32_0 : i32, i32
  }
  func.func @transform_5(%arg0: i32) -> (i32, i32) {
    %c0_i32 = arith.constant 0 : i32
    %c0_i32_0 = arith.constant 0 : i32
    %c0_i32_1 = arith.constant 0 : i32
    return %c0_i32, %c0_i32_0 : i32, i32
  }
  func.func @transform_6(%arg0: i32) -> (i32, i32) {
    %c0_i32 = arith.constant 0 : i32
    %c0_i32_0 = arith.constant 0 : i32
    %c0_i32_1 = arith.constant 0 : i32
    return %c0_i32, %c0_i32_0 : i32, i32
  }
  func.func @transform_7(%arg0: i32) -> (i32, i32) {
    %c0_i32 = arith.constant 0 : i32
    %c0_i32_0 = arith.constant 0 : i32
    %c0_i32_1 = arith.constant 0 : i32
    return %c0_i32, %c0_i32_0 : i32, i32
  }
  func.func @transform_8(%arg0: i32) -> (i32, i32) {
    %c0_i32 = arith.constant 0 : i32
    %c0_i32_0 = arith.constant 0 : i32
    return %arg0, %c0_i32 : i32, i32
  }
}

</mosaic_0001>

<bundles_post_ra>
// kernel: tpu_custom_call.1
= control target key start
LH: loop header
LB: loop body
LE: loop exit
PB: predicated region body
PF: predicated region fallthrough
CT: control target
= control target key end

     0   :  { %13 = vsyncpa [#allocation3], 0  ;;  %s452_s0 = inlined_call_operand.hbm [shape: f32[16,32], index: 0, kind: input, shape index: {}]   ;;  %s453_s1 = inlined_call_operand.hbm [shape: f32[16,32], index: 1, kind: input, shape index: {}]   ;;  %s454_s2 = inlined_call_operand.hbm [shape: bf16[32,32], index: 2, kind: input, shape index: {}]   ;;  %s455_s3 = inlined_call_operand.vmem [shape: f32[1,32], index: 3, kind: input, shape index: {}]   ;;  %s456_s4 = inlined_call_operand.vmem [shape: f32[1,32], index: 4, kind: input, shape index: {}]   ;;  %s457_s5 = inlined_call_operand.vmem [shape: f32[1,32], index: 5, kind: input, shape index: {}]   ;;  %s458_s6 = inlined_call_operand.vmem [shape: f32[1,32], index: 6, kind: input, shape index: {}]   ;;  %s459_s7 = inlined_call_operand.vmem [shape: f32[1,32], index: 7, kind: input, shape index: {}]   ;;  %s460_s8 = inlined_call_operand.hbm [shape: f32[16,32], index: 8, kind: output, shape index: {}]  }
   0x1   :  { %14 = vsyncpa [#allocation6], 0 }
   0x2   :  { %15 = vsyncpa [#allocation4], 0  ;;  %s354_s27 = smov [#allocation5]   ;;  %s355_s29 = smov [#allocation2]  }
   0x3   :  { %s33_s28 = sshll.u32 %s354_s27, 4  ;;  %s21_s30 = sshll.u32 %s355_s29, 4  ;;  %s34_s28 = int_to_ptr.vmem [resolvable:$true] %s33_s28  ;;  %s22_s30 = int_to_ptr.vmem [resolvable:$true] %s21_s30 }
   0x4   :  { %s276_s9 = scalar_lea.vmem %s34_s28, 256  ;;  %p281_p1 = scmp.lt.s32.totalorder %s34_s28, %s34_s28 }
   0x5   :  { %p277_p0 = scmp.ne.s32.totalorder %s34_s28, %s276_s9  ;;  %p282_p2 = scmp.lt.s32.totalorder %s276_s9, %s276_s9 }
   0x7   :  { %p283_p3 = por %p282_p2, %p281_p1 }
   0x9   :  { %p284_p4 = pnand %p283_p3, %p277_p0 }
   0xb   :  { %287 = shalt.err (!%p284_p4)
}
   0xc   :  { %s356_s10 = smov 128   ;;  %s357_s11 = smov 8  }
   0xd   :  { %39 = dma.hbm_to_vmem [thread:$0]  %s453_s1, 256, %s34_s28, [#allocation6], %s356_s10, %s356_s10, %s357_s11  }
   0xe   :  { %s296_s14 = scalar_lea.vmem %s22_s30, 256  ;;  %p301_p6 = scmp.lt.s32.totalorder %s22_s30, %s22_s30 }
   0xf   :  { %p297_p5 = scmp.ne.s32.totalorder %s22_s30, %s296_s14  ;;  %p302_p7 = scmp.lt.s32.totalorder %s296_s14, %s296_s14 }
  0x11   :  { %p303_p8 = por %p302_p7, %p301_p6 }
  0x13   :  { %p304_p9 = pnand %p303_p8, %p297_p5 }
  0x15   :  { %307 = shalt.err (!%p304_p9)
}
  0x16   :  { %27 = dma.hbm_to_vmem [thread:$0]  %s452_s0, 256, %s22_s30, [#allocation3], %s356_s10, %s356_s10, %s357_s11  }
  0x17   :  { %s358_s17 = smov [#allocation7]  }
  0x18   :  { %s45_s18 = sshll.u32 %s358_s17, 4  ;;  %s46_s18 = int_to_ptr.vmem [resolvable:$true] %s45_s18 }
  0x19   :  { %s316_s19 = scalar_lea.vmem %s46_s18, 256  ;;  %p321_p11 = scmp.lt.s32.totalorder %s46_s18, %s46_s18 }
  0x1a   :  { %p317_p10 = scmp.ne.s32.totalorder %s46_s18, %s316_s19  ;;  %p322_p12 = scmp.lt.s32.totalorder %s316_s19, %s316_s19 }
  0x1c   :  { %p323_p13 = por %p322_p12, %p321_p11 }
  0x1e   :  { %p324_p0 = pnand %p323_p13, %p317_p10 }
  0x20   :  { %327 = shalt.err (!%p324_p0)
}
  0x21   :  { %s359_s1 = smov 64   ;;  %s360_s20 = smov 4  }
  0x22   :  { %51 = dma.hbm_to_vmem [thread:$0]  %s454_s2, 256, %s46_s18, [#allocation6], %s359_s1, %s359_s1, %s360_s20  }
  0x23   :  { %348 = dma.done.wait [#allocation3], 256  }
  0x24   :  { %349 = vsyncadd [#allocation3], 4294967040 }
  0x25   :  { %350 = dma.done.wait [#allocation6], 512  }
  0x26   :  { %351 = vsyncadd [#allocation6], 4294966784  ;;  %v361_v0 = vmov 0.0   ;;  %vm362_vm0 = vmmov 0   ;;  %v262_v1 = vld [vmem:[#allocation7 + $0x8] sm:$0xff]   ;;  %v263_v2 = vld [vmem:[#allocation7] sm:$0xff]  }
  0x27   :  { %244 = vmatprep.subr.bf16.mxu0 %v361_v0  ;;  %248 = vmatprep.mubr.msk.bf16.mxu0 %vm362_vm0, %v361_v0  ;;  %v72_v3 = vld [vmem:[#allocation2] sm:$0xff]  ;;  %v73_v4 = vld [vmem:[#allocation2 + $0x8] sm:$0xff]  ;;  %vm98_vm1 = vcmask 261120   ;;  %v152_v10 = vld [vmem:[#allocation5] sm:$0xff]  ;;  %s363_s28 = smov [#allocation8]  }
  0x28   :  { %245 = vmatpush3.bf16.msra.mxu0 %v262_v1  ;;  %v74_v5 = vpack.c.bf16 %v73_v4, %v72_v3  ;;  %v233_v6 = vld [vmem:[%s455_s3] ss:$0 sm:$0xff]  ;;  %v153_v17 = vld [vmem:[#allocation5 + $0x8] sm:$0xff]  ;;  %s220_s29 = sshll.u32 %s363_s28, 4  ;;  %s221_s29 = int_to_ptr.vmem [resolvable:$true] %s220_s29 }
  0x29   :  { %246 = vmatprep.subr.bf16.mxu0 %v361_v0  ;;  %v237_v8 = vld [vmem:[%s456_s4] ss:$0 sm:$0xff]  ;;  %p333_p2 = scmp.lt.s32.totalorder %s221_s29, %s221_s29 }
  0x2a   :  { %v238_v14 = vld [vmem:[%s457_s5] ss:$0 sm:$0xff] }
  0x2b   :  { %v239_v45 = vld [vmem:[%s458_s6] ss:$0 sm:$0xff]  ;;  %s328_s6 = scalar_lea.vmem %s221_s29, 256 }
  0x2c   :  { %247 = vmatpush3.bf16.msra.mxu0 %v263_v2  ;;  %v240_v47 = vld [vmem:[%s459_s7] ss:$0 sm:$0xff]  ;;  %p329_p1 = scmp.ne.s32.totalorder %s221_s29, %s328_s6  ;;  %p334_p3 = scmp.lt.s32.totalorder %s328_s6, %s328_s6 }
  0x2e   :  { %p335_p4 = por %p334_p3, %p333_p2 }
  0x2f   :  { %249 = vmatmul.mubr.msk.bf16.vlgmr.msra.gmra.mxu0 %vm98_vm1, %v74_v5 }
  0x30   :  { %p336_p5 = pnand %p335_p4, %p329_p1 }
  0xef   :  { %v136_v7 = vpop.f32.mrf.mxu0 }
  0xf0   :  { %v137_v9 = vadd.f32 %v233_v6, %v136_v7 }
  0xf1   :  { %v250_v11 = vpop.f32.mrf.mxu0 }
  0xf2   :  { %v150_v12 = vmul.f32 %v237_v8, %v137_v9 }
  0xf3   :  { %v139_v13 = vpop.f32.mrf.mxu0 }
  0xf4   :  { %v154_v15 = vadd.f32 %v152_v10, %v150_v12  ;;  %v140_v16 = vadd.f32 %v233_v6, %v139_v13 }
  0xf5   :  { %v251_v18 = vpop.f32.mrf.mxu0 }
  0xf6   :  { %v151_v19 = vmul.f32 %v237_v8, %v140_v16  ;;  %v163_v20 = vmul.f32 %v238_v14, %v154_v15  ;;  %v171_v21 = vmul.f32 %v154_v15, %v154_v15 }
  0xf8   :  { %v155_v22 = vadd.f32 %v153_v17, %v151_v19  ;;  %v165_v23 = vsel %vm98_vm1, %v163_v20, 0.0  ;;  %v173_v24 = vmul.f32 %v238_v14, %v171_v21 }
  0xf9   :  { %166 = vadd.xlane.f32.xlu0 %v165_v23 }
  0xfa   :  { %v175_v25 = vsel %vm98_vm1, %v173_v24, 0.0  ;;  %v164_v26 = vmul.f32 %v238_v14, %v155_v22  ;;  %v172_v27 = vmul.f32 %v155_v22, %v155_v22 }
  0xfb   :  { %176 = vadd.xlane.f32.xlu1 %v175_v25 }
  0xfc   :  { %v168_v28 = vsel %vm98_vm1, %v164_v26, 0.0  ;;  %v174_v29 = vmul.f32 %v238_v14, %v172_v27 }
  0xfd   :  { %169 = vadd.xlane.f32.xlu0 %v168_v28 }
  0xfe   :  { %v178_v30 = vsel %vm98_vm1, %v174_v29, 0.0 }
  0xff   :  { %179 = vadd.xlane.f32.xlu1 %v178_v30 }
 0x182   :  { %v167_v31 = vpop.xlane.xlu0 %166 }
 0x183   :  { %v181_v32 = vmul.f32 %v167_v31, %v167_v31  ;;  %v191_v43 = vsub.f32 %v154_v15, %v167_v31 }
 0x184   :  { %v177_v33 = vpop.xlane.xlu1 %176 }
 0x185   :  { %v183_v34 = vsub.f32 %v177_v33, %v181_v32 }
 0x186   :  { %v170_v35 = vpop.xlane.xlu0 %169 }
 0x187   :  { %v185_v36 = vmax.f32 %v183_v34, 0.0  ;;  %v182_v37 = vmul.f32 %v170_v35, %v170_v35  ;;  %v192_v48 = vsub.f32 %v155_v22, %v170_v35 }
 0x188   :  { %v180_v38 = vpop.xlane.xlu1 %179 }
 0x189   :  { %v187_v39 = vadd.f32 1e-12, %v185_v36  ;;  %v184_v40 = vsub.f32 %v180_v38, %v182_v37 }
 0x18b   :  { %264 = vrsqrt.f32 %v187_v39  ;;  %v186_v41 = vmax.f32 %v184_v40, 0.0 }
 0x18d   :  { %v188_v42 = vadd.f32 1e-12, %v186_v41 }
 0x18f   :  { %266 = vrsqrt.f32 %v188_v42 }
 0x198   :  { %v265_v44 = vpop.eup %264 }
 0x199   :  { %v193_v46 = vmul.f32 %v265_v44, %v191_v43 }
 0x19b   :  { %v202_v49 = vmul.f32 %v239_v45, %v193_v46 }
 0x19c   :  { %v267_v50 = vpop.eup %266 }
 0x19d   :  { %v194_v51 = vmul.f32 %v267_v50, %v192_v48  ;;  %v211_v52 = vadd.f32 %v240_v47, %v202_v49 }
 0x19f   :  { %v203_v53 = vmul.f32 %v239_v45, %v194_v51  ;;  %213 = vst.msk [vmem:[#allocation8] sm:$0xff] %vm98_vm1, %v211_v52 }
 0x1a1   :  { %v212_v54 = vadd.f32 %v240_v47, %v203_v53 }
 0x1a3   :  { %214 = vst.msk [vmem:[#allocation8 + $0x8] sm:$0xff] %vm98_vm1, %v212_v54 }
 0x1a4   :  { %339 = shalt.err (!%p336_p5)
}
 0x1a5   :  { %226 = dma.vmem_to_hbm [thread:$0]  %s221_s29, 256, %s460_s8, [#allocation4], %s356_s10, %s356_s10, %s357_s11  }
 0x1a6   :  { %352 = dma.done.wait [#allocation4], 256  }
 0x1a7   :  { %353 = vsyncadd [#allocation4], 4294967040 }
 0x1a8   :  { %230 = vsyncpa [#allocation3], 1 }
 0x1a9   :  { %231 = vsyncpa [#allocation6], 1 }
 0x1aa   :  { %232 = vsyncpa [#allocation4], 1 }

// kernel: tpu_custom_call.1
= control target key start
LH: loop header
LB: loop body
LE: loop exit
PB: predicated region body
PF: predicated region fallthrough
CT: control target
= control target key end

     0   :  { %13 = vsyncpa [#allocation3], 0  ;;  %s452_s0 = inlined_call_operand.hbm [shape: f32[16,32], index: 0, kind: input, shape index: {}]   ;;  %s453_s1 = inlined_call_operand.hbm [shape: f32[16,32], index: 1, kind: input, shape index: {}]   ;;  %s454_s2 = inlined_call_operand.hbm [shape: bf16[32,32], index: 2, kind: input, shape index: {}]   ;;  %s455_s3 = inlined_call_operand.vmem [shape: f32[1,32], index: 3, kind: input, shape index: {}]   ;;  %s456_s4 = inlined_call_operand.vmem [shape: f32[1,32], index: 4, kind: input, shape index: {}]   ;;  %s457_s5 = inlined_call_operand.vmem [shape: f32[1,32], index: 5, kind: input, shape index: {}]   ;;  %s458_s6 = inlined_call_operand.vmem [shape: f32[1,32], index: 6, kind: input, shape index: {}]   ;;  %s459_s7 = inlined_call_operand.vmem [shape: f32[1,32], index: 7, kind: input, shape index: {}]   ;;  %s460_s8 = inlined_call_operand.hbm [shape: f32[16,32], index: 8, kind: output, shape index: {}]  }
   0x1   :  { %14 = vsyncpa [#allocation6], 0 }
   0x2   :  { %15 = vsyncpa [#allocation4], 0  ;;  %s354_s27 = smov [#allocation5]   ;;  %s355_s29 = smov [#allocation2]  }
   0x3   :  { %s33_s28 = sshll.u32 %s354_s27, 4  ;;  %s21_s30 = sshll.u32 %s355_s29, 4  ;;  %s34_s28 = int_to_ptr.vmem [resolvable:$true] %s33_s28  ;;  %s22_s30 = int_to_ptr.vmem [resolvable:$true] %s21_s30 }
   0x4   :  { %s276_s9 = scalar_lea.vmem %s34_s28, 256  ;;  %p281_p1 = scmp.lt.s32.totalorder %s34_s28, %s34_s28 }
   0x5   :  { %p277_p0 = scmp.ne.s32.totalorder %s34_s28, %s276_s9  ;;  %p282_p2 = scmp.lt.s32.totalorder %s276_s9, %s276_s9 }
   0x7   :  { %p283_p3 = por %p282_p2, %p281_p1 }
   0x9   :  { %p284_p4 = pnand %p283_p3, %p277_p0 }
   0xb   :  { %287 = shalt.err (!%p284_p4)
}
   0xc   :  { %s356_s10 = smov 128   ;;  %s357_s11 = smov 8  }
   0xd   :  { %39 = dma.hbm_to_vmem [thread:$0]  %s453_s1, 256, %s34_s28, [#allocation6], %s356_s10, %s356_s10, %s357_s11  }
   0xe   :  { %s296_s14 = scalar_lea.vmem %s22_s30, 256  ;;  %p301_p6 = scmp.lt.s32.totalorder %s22_s30, %s22_s30 }
   0xf   :  { %p297_p5 = scmp.ne.s32.totalorder %s22_s30, %s296_s14  ;;  %p302_p7 = scmp.lt.s32.totalorder %s296_s14, %s296_s14 }
  0x11   :  { %p303_p8 = por %p302_p7, %p301_p6 }
  0x13   :  { %p304_p9 = pnand %p303_p8, %p297_p5 }
  0x15   :  { %307 = shalt.err (!%p304_p9)
}
  0x16   :  { %27 = dma.hbm_to_vmem [thread:$0]  %s452_s0, 256, %s22_s30, [#allocation3], %s356_s10, %s356_s10, %s357_s11  }
  0x17   :  { %s358_s17 = smov [#allocation7]  }
  0x18   :  { %s45_s18 = sshll.u32 %s358_s17, 4  ;;  %s46_s18 = int_to_ptr.vmem [resolvable:$true] %s45_s18 }
  0x19   :  { %s316_s19 = scalar_lea.vmem %s46_s18, 256  ;;  %p321_p11 = scmp.lt.s32.totalorder %s46_s18, %s46_s18 }
  0x1a   :  { %p317_p10 = scmp.ne.s32.totalorder %s46_s18, %s316_s19  ;;  %p322_p12 = scmp.lt.s32.totalorder %s316_s19, %s316_s19 }
  0x1c   :  { %p323_p13 = por %p322_p12, %p321_p11 }
  0x1e   :  { %p324_p0 = pnand %p323_p13, %p317_p10 }
  0x20   :  { %327 = shalt.err (!%p324_p0)
}
  0x21   :  { %s359_s1 = smov 64   ;;  %s360_s20 = smov 4  }
  0x22   :  { %51 = dma.hbm_to_vmem [thread:$0]  %s454_s2, 256, %s46_s18, [#allocation6], %s359_s1, %s359_s1, %s360_s20  }
  0x23   :  { %348 = dma.done.wait [#allocation3], 256  }
  0x24   :  { %349 = vsyncadd [#allocation3], 4294967040 }
  0x25   :  { %350 = dma.done.wait [#allocation6], 512  }
  0x26   :  { %351 = vsyncadd [#allocation6], 4294966784  ;;  %v361_v0 = vmov 0.0   ;;  %vm362_vm0 = vmmov 0   ;;  %v262_v1 = vld [vmem:[#allocation7 + $0x8] sm:$0xff]   ;;  %v263_v2 = vld [vmem:[#allocation7] sm:$0xff]  }
  0x27   :  { %244 = vmatprep.subr.bf16.mxu0 %v361_v0  ;;  %248 = vmatprep.mubr.msk.bf16.mxu0 %vm362_vm0, %v361_v0  ;;  %v72_v3 = vld [vmem:[#allocation2] sm:$0xff]  ;;  %v73_v4 = vld [vmem:[#allocation2 + $0x8] sm:$0xff]  ;;  %vm98_vm1 = vcmask 261120   ;;  %v152_v10 = vld [vmem:[#allocation5] sm:$0xff]  ;;  %s363_s28 = smov [#allocation8]  }
  0x28   :  { %245 = vmatpush3.bf16.msra.mxu0 %v262_v1  ;;  %v74_v5 = vpack.c.bf16 %v73_v4, %v72_v3  ;;  %v233_v6 = vld [vmem:[%s455_s3] ss:$0 sm:$0xff]  ;;  %v153_v17 = vld [vmem:[#allocation5 + $0x8] sm:$0xff]  ;;  %s220_s29 = sshll.u32 %s363_s28, 4  ;;  %s221_s29 = int_to_ptr.vmem [resolvable:$true] %s220_s29 }
  0x29   :  { %246 = vmatprep.subr.bf16.mxu0 %v361_v0  ;;  %v237_v8 = vld [vmem:[%s456_s4] ss:$0 sm:$0xff]  ;;  %p333_p2 = scmp.lt.s32.totalorder %s221_s29, %s221_s29 }
  0x2a   :  { %v238_v14 = vld [vmem:[%s457_s5] ss:$0 sm:$0xff] }
  0x2b   :  { %v239_v45 = vld [vmem:[%s458_s6] ss:$0 sm:$0xff]  ;;  %s328_s6 = scalar_lea.vmem %s221_s29, 256 }
  0x2c   :  { %247 = vmatpush3.bf16.msra.mxu0 %v263_v2  ;;  %v240_v47 = vld [vmem:[%s459_s7] ss:$0 sm:$0xff]  ;;  %p329_p1 = scmp.ne.s32.totalorder %s221_s29, %s328_s6  ;;  %p334_p3 = scmp.lt.s32.totalorder %s328_s6, %s328_s6 }
  0x2e   :  { %p335_p4 = por %p334_p3, %p333_p2 }
  0x2f   :  { %249 = vmatmul.mubr.msk.bf16.vlgmr.msra.gmra.mxu0 %vm98_vm1, %v74_v5 }
  0x30   :  { %p336_p5 = pnand %p335_p4, %p329_p1 }
  0xef   :  { %v136_v7 = vpop.f32.mrf.mxu0 }
  0xf0   :  { %v137_v9 = vadd.f32 %v233_v6, %v136_v7 }
  0xf1   :  { %v250_v11 = vpop.f32.mrf.mxu0 }
  0xf2   :  { %v150_v12 = vmul.f32 %v237_v8, %v137_v9 }
  0xf3   :  { %v139_v13 = vpop.f32.mrf.mxu0 }
  0xf4   :  { %v154_v15 = vadd.f32 %v152_v10, %v150_v12  ;;  %v140_v16 = vadd.f32 %v233_v6, %v139_v13 }
  0xf5   :  { %v251_v18 = vpop.f32.mrf.mxu0 }
  0xf6   :  { %v151_v19 = vmul.f32 %v237_v8, %v140_v16  ;;  %v163_v20 = vmul.f32 %v238_v14, %v154_v15  ;;  %v171_v21 = vmul.f32 %v154_v15, %v154_v15 }
  0xf8   :  { %v155_v22 = vadd.f32 %v153_v17, %v151_v19  ;;  %v165_v23 = vsel %vm98_vm1, %v163_v20, 0.0  ;;  %v173_v24 = vmul.f32 %v238_v14, %v171_v21 }
  0xf9   :  { %166 = vadd.xlane.f32.xlu0 %v165_v23 }
  0xfa   :  { %v175_v25 = vsel %vm98_vm1, %v173_v24, 0.0  ;;  %v164_v26 = vmul.f32 %v238_v14, %v155_v22  ;;  %v172_v27 = vmul.f32 %v155_v22, %v155_v22 }
  0xfb   :  { %176 = vadd.xlane.f32.xlu1 %v175_v25 }
  0xfc   :  { %v168_v28 = vsel %vm98_vm1, %v164_v26, 0.0  ;;  %v174_v29 = vmul.f32 %v238_v14, %v172_v27 }
  0xfd   :  { %169 = vadd.xlane.f32.xlu0 %v168_v28 }
  0xfe   :  { %v178_v30 = vsel %vm98_vm1, %v174_v29, 0.0 }
  0xff   :  { %179 = vadd.xlane.f32.xlu1 %v178_v30 }
 0x182   :  { %v167_v31 = vpop.xlane.xlu0 %166 }
 0x183   :  { %v181_v32 = vmul.f32 %v167_v31, %v167_v31  ;;  %v191_v43 = vsub.f32 %v154_v15, %v167_v31 }
 0x184   :  { %v177_v33 = vpop.xlane.xlu1 %176 }
 0x185   :  { %v183_v34 = vsub.f32 %v177_v33, %v181_v32 }
 0x186   :  { %v170_v35 = vpop.xlane.xlu0 %169 }
 0x187   :  { %v185_v36 = vmax.f32 %v183_v34, 0.0  ;;  %v182_v37 = vmul.f32 %v170_v35, %v170_v35  ;;  %v192_v48 = vsub.f32 %v155_v22, %v170_v35 }
 0x188   :  { %v180_v38 = vpop.xlane.xlu1 %179 }
 0x189   :  { %v187_v39 = vadd.f32 1e-12, %v185_v36  ;;  %v184_v40 = vsub.f32 %v180_v38, %v182_v37 }
 0x18b   :  { %264 = vrsqrt.f32 %v187_v39  ;;  %v186_v41 = vmax.f32 %v184_v40, 0.0 }
 0x18d   :  { %v188_v42 = vadd.f32 1e-12, %v186_v41 }
 0x18f   :  { %266 = vrsqrt.f32 %v188_v42 }
 0x198   :  { %v265_v44 = vpop.eup %264 }
 0x199   :  { %v193_v46 = vmul.f32 %v265_v44, %v191_v43 }
 0x19b   :  { %v202_v49 = vmul.f32 %v239_v45, %v193_v46 }
 0x19c   :  { %v267_v50 = vpop.eup %266 }
 0x19d   :  { %v194_v51 = vmul.f32 %v267_v50, %v192_v48  ;;  %v211_v52 = vadd.f32 %v240_v47, %v202_v49 }
 0x19f   :  { %v203_v53 = vmul.f32 %v239_v45, %v194_v51  ;;  %213 = vst.msk [vmem:[#allocation8] sm:$0xff] %vm98_vm1, %v211_v52 }
 0x1a1   :  { %v212_v54 = vadd.f32 %v240_v47, %v203_v53 }
 0x1a3   :  { %214 = vst.msk [vmem:[#allocation8 + $0x8] sm:$0xff] %vm98_vm1, %v212_v54 }
 0x1a4   :  { %339 = shalt.err (!%p336_p5)
}
 0x1a5   :  { %226 = dma.vmem_to_hbm [thread:$0]  %s221_s29, 256, %s460_s8, [#allocation4], %s356_s10, %s356_s10, %s357_s11  }
 0x1a6   :  { %352 = dma.done.wait [#allocation4], 256  }
 0x1a7   :  { %353 = vsyncadd [#allocation4], 4294967040 }
 0x1a8   :  { %230 = vsyncpa [#allocation3], 1 }
 0x1a9   :  { %231 = vsyncpa [#allocation6], 1 }
 0x1aa   :  { %232 = vsyncpa [#allocation4], 1 }

</bundles_post_ra>
